<compile_context>
chip_gen: v7x
topology: tpu7x:2x2x1
jax: 0.10.0
libtpu: 0.0.40
codegen_flags: <defaults>
</compile_context>

<pallas_src>
import functools

import jax
import jax.numpy as jnp
from jax.experimental import pallas as pl
from jax.experimental.pallas import tpu as pltpu


_TILE_BUDGET_BYTES = 24 * 1024 * 1024   # all double-buffered tiles together
_VMEM_LIMIT_BYTES = 40 * 1024 * 1024    # > v5e's 16 MiB default, < v7x's 64 MiB


# ---------------------------------------------------------------------------
# Kernels
# ---------------------------------------------------------------------------
def _residual_add_kernel(fx_ref, x_ref, o_ref):
    # out = fn(x) + x for one (tm, d) tile: VPU elementwise add with an
    # unmasked lane-dense vst thanks to the lane-dense flatten in the wrapper.
    o_ref[...] = (fx_ref[...] + x_ref[...]).astype(o_ref.dtype)


def _make_fused_kernel(fn):
    def kernel(x_ref, o_ref):
        xb = x_ref[...]
        o_ref[...] = (fn(xb) + xb).astype(o_ref.dtype)
    return kernel


# ---------------------------------------------------------------------------
# Layout / tiling helpers
# ---------------------------------------------------------------------------
def _min_sublanes(itemsize):
    """Sublane packing granularity: f32 -> 8 rows, bf16 -> 16, int8/fp8 -> 32."""
    return max(8, (8 * 4) // max(1, int(itemsize)))


def _plan_flatten(total, min_itemsize):
    """Pick a lane-dense (multiple-of-128) 2-D slab (m, d) for `total` elements.

    Guarantees d % 128 == 0 and m % min_rows == 0, padding the flattened slab
    when `total` has no suitable divisor (never emits masked partial stores).
    Returns (m, d, pad_elements, min_rows).
    """
    min_rows = _min_sublanes(min_itemsize)
    for want_rows in (2 * min_rows, min_rows):   # prefer >= 2 row-tiles of work
        for d in (2048, 1024, 512, 256, 128):
            if total % (d * min_rows) == 0 and total // d >= want_rows:
                return total // d, d, 0, min_rows
    d = 128
    chunk = d * min_rows
    padded = -(-total // chunk) * chunk
    return padded // d, d, padded - total, min_rows


def _choose_row_tile(m, row_bytes, min_rows):
    """Largest row tile tm that divides m, is sublane-pack aligned, and keeps
    the double-buffered footprint of all arrays under the VMEM budget.
    Prefers a tile that leaves >= 2 grid steps (2-TC sharding on v7x)."""
    max_tm = max(min_rows, _TILE_BUDGET_BYTES // (2 * row_bytes))
    best_multi = best_any = None
    i = 1
    while i * i <= m:
        if m % i == 0:
            for t in (i, m // i):
                if t % min_rows or t > max_tm:
                    continue
                if best_any is None or t > best_any:
                    best_any = t
                if m // t >= 2 and (best_multi is None or t > best_multi):
                    best_multi = t
        i += 1
    if best_multi is not None:
        return best_multi
    if best_any is not None:
        return best_any
    return min_rows  # m is a multiple of min_rows by construction


def _to_slab(arr, m, d, pad):
    flat = arr.reshape(-1)
    if pad:
        flat = jnp.pad(flat, (0, pad))
    return flat.reshape(m, d)


_PARALLEL_SEM = None


def _parallel_sem():
    """Semantic for the single parallel grid axis.

    Prefer CORE_PARALLEL so the grid is sharded across both TensorCores on
    v7x; fall back to "parallel" if the chip/compiler rejects it (probed once
    on a tiny kernel, result verified and cached)."""
    global _PARALLEL_SEM
    if _PARALLEL_SEM is not None:
        return _PARALLEL_SEM
    sem = "parallel"
    core_parallel = getattr(pltpu, "CORE_PARALLEL", None)
    if core_parallel is not None:
        try:
            def _probe(x_ref, o_ref):
                o_ref[...] = x_ref[...] + 1.0

            out = pl.pallas_call(
                _probe,
                out_shape=jax.ShapeDtypeStruct((24, 128), jnp.float32),
                grid=(3,),                       # odd: checks uneven sharding
                in_specs=[pl.BlockSpec((8, 128), lambda i: (i, 0))],
                out_specs=pl.BlockSpec((8, 128), lambda i: (i, 0)),
                compiler_params=pltpu.CompilerParams(
                    dimension_semantics=(core_parallel,)),
            )(jnp.zeros((24, 128), jnp.float32))
            if bool(jnp.all(jax.block_until_ready(out) == 1.0)):
                sem = core_parallel
        except Exception:
            sem = "parallel"
    _PARALLEL_SEM = sem
    return sem


def _run_elementwise(kernel, flats, out_dtype, m, d, min_rows, alias_first=False):
    out_itemsize = int(jnp.dtype(out_dtype).itemsize)
    in_itemsize = sum(int(a.dtype.itemsize) for a in flats)
    row_bytes = d * (in_itemsize + out_itemsize)
    tm = _choose_row_tile(m, row_bytes, min_rows)
    spec = pl.BlockSpec((tm, d), lambda i: (i, 0))
    return pl.pallas_call(
        kernel,
        out_shape=jax.ShapeDtypeStruct((m, d), out_dtype),
        grid_spec=pltpu.PrefetchScalarGridSpec(
            num_scalar_prefetch=0,
            grid=(m // tm,),
            in_specs=[spec] * len(flats),
            out_specs=spec,
        ),
        # Default double-buffering (depth 2) on purpose: the kernel is pure
        # DMA, so VMEM is spent on bigger tiles rather than deeper pipelines.
        compiler_params=pltpu.CompilerParams(
            dimension_semantics=(_parallel_sem(),),
            vmem_limit_bytes=_VMEM_LIMIT_BYTES),
        cost_estimate=pl.CostEstimate(
            flops=m * d, transcendentals=0,
            bytes_accessed=m * d * (in_itemsize + out_itemsize)),
        # fn(x) is dead after the add: alias it to the output (PyTorch's
        # in-place `x += res`), saving a third HBM buffer under jit.
        input_output_aliases=({0: 0} if alias_first else {}),
    )(*flats)


# ---------------------------------------------------------------------------
# Public API
# ---------------------------------------------------------------------------
def residual_add(fn_x, x):
    """General path of `x = fn(x) + x`: fn already ran in JAX, only the
    residual add runs in Pallas (2 HBM reads + 1 aliased write)."""
    assert fn_x.shape == x.shape, (fn_x.shape, x.shape)
    shape = x.shape
    out_dtype = fn_x.dtype               # PyTorch result dtype is fn(x).dtype
    total = int(x.size)
    min_itemsize = min(int(fn_x.dtype.itemsize), int(x.dtype.itemsize))
    m, d, pad, min_rows = _plan_flatten(total, min_itemsize)
    out = _run_elementwise(
        _residual_add_kernel,
        [_to_slab(fn_x, m, d, pad), _to_slab(x, m, d, pad)],
        out_dtype, m, d, min_rows, alias_first=True)
    if pad:
        out = out.reshape(-1)[:total]
    return out.reshape(shape)


def residual_add_fused(x, fn):
    """Fused path: out = fn(x) + x entirely inside the kernel (1 HBM read +
    1 write). `fn` must be strictly elementwise (applied per lane-dense tile)."""
    shape = x.shape
    total = int(x.size)
    try:
        out_dtype = jax.eval_shape(
            fn, jax.ShapeDtypeStruct((8, 128), x.dtype)).dtype
    except Exception:
        out_dtype = x.dtype
    min_itemsize = min(int(x.dtype.itemsize), int(jnp.dtype(out_dtype).itemsize))
    m, d, pad, min_rows = _plan_flatten(total, min_itemsize)
    out = _run_elementwise(
        _make_fused_kernel(fn), [_to_slab(x, m, d, pad)],
        out_dtype, m, d, min_rows)
    if pad:
        out = out.reshape(-1)[:total]
    return out.reshape(shape)


def _looks_elementwise(fn, dtype):
    """Heuristic probe (tiny, concrete): fuse only if fn's output is invariant
    to reshaping and to tiling its input, i.e. strictly elementwise. Any
    mismatch or exception (opaque fn, traced closure, shape change) routes to
    the general path."""
    try:
        probe = jnp.linspace(-2.0, 3.0, 8 * 128,
                             dtype=jnp.float32).reshape(8, 128).astype(dtype)
        a = fn(probe)
        if a.shape != probe.shape:
            return False
        a32 = a.astype(jnp.float32)
        b32 = fn(probe.reshape(16, 64)).reshape(8, 128).astype(jnp.float32)
        c32 = fn(probe[:4, :64]).astype(jnp.float32)
        return bool(jnp.allclose(a32, b32, rtol=1e-4, atol=1e-4)
                    and jnp.allclose(a32[:4, :64], c32, rtol=1e-4, atol=1e-4))
    except Exception:
        return False


class ResidualAdd:
    """JAX/Pallas port of the PyTorch ResidualAdd module.

    fuse_elementwise:
      None (default) -> auto: strictly elementwise fns (detected by a tiny
                        concrete probe, cached per dtype) are fused into the
                        kernel; everything else uses the general path.
      True           -> always fuse (caller asserts fn is elementwise).
      False          -> never fuse.
    """

    def __init__(self, fn, fuse_elementwise=None):
        self.fn = fn
        self.fuse_elementwise = fuse_elementwise
        self._auto_cache = {}

    def __call__(self, x, **kwargs):
        fn = functools.partial(self.fn, **kwargs) if kwargs else self.fn
        fuse = self.fuse_elementwise
        if fuse is None:
            if kwargs:
                fuse = False            # kwargs may be traced; stay general
            else:
                key = jnp.dtype(x.dtype).name
                if key not in self._auto_cache:
                    self._auto_cache[key] = _looks_elementwise(self.fn, x.dtype)
                fuse = self._auto_cache[key]
        if fuse:
            return residual_add_fused(x, fn)
        # TODO(synk): arbitrary fn (attention / MLP sub-blocks) has no generic
        # in-kernel equivalent; fn runs as plain JAX and only the residual add
        # is a Pallas kernel (with fn(x) aliased to the output).
        fx = fn(x)
        return residual_add(fx, x)


# ---------------------------------------------------------------------------
# Self-test
# ---------------------------------------------------------------------------
if __name__ == "__main__":
    key = jax.random.PRNGKey(0)
    k1, k2, k3, k4 = jax.random.split(key, 4)

    # (1) transformer-style residual, elementwise fn -> auto-fused path
    B, S, D = 2, 8, 128
    x = jax.random.normal(k1, (B, S, D), dtype=jnp.float32)
    out = jax.block_until_ready(ResidualAdd(jax.nn.gelu)(x))
    ref = jax.nn.gelu(x) + x
    assert out.shape == x.shape and out.dtype == x.dtype
    assert jnp.allclose(out, ref, atol=1e-5, rtol=1e-5)

    # (2) explicit fused path; NCHW activation with a small trailing dim still
    #     gets a lane-dense flatten (no masked partial stores)
    x2 = jax.random.normal(k2, (2, 4, 16, 16), dtype=jnp.float32)
    out2 = jax.block_until_ready(
        ResidualAdd(lambda t: t * 0.5 + 1.0, fuse_elementwise=True)(x2))
    assert jnp.allclose(out2, x2 * 0.5 + 1.0 + x2, atol=1e-6, rtol=1e-6)

    # (3) non-elementwise fn -> general path (fn in JAX, aliased add kernel)
    fn3 = lambda t: jax.nn.softmax(t, axis=-1)
    out3 = jax.block_until_ready(ResidualAdd(fn3)(x))
    assert jnp.allclose(out3, fn3(x) + x, atol=1e-5, rtol=1e-5)

    # (4) awkward total -> padded lane-dense slab
    x4 = jax.random.normal(k3, (3, 5, 7), dtype=jnp.float32)
    out4 = jax.block_until_ready(ResidualAdd(jnp.tanh)(x4))
    assert out4.shape == x4.shape
    assert jnp.allclose(out4, jnp.tanh(x4) + x4, atol=1e-5, rtol=1e-5)

    # (5) bf16: sublane-pack-aware (16-row) tiling
    x5 = jax.random.normal(k4, (4, 16, 256), dtype=jnp.bfloat16)
    out5 = jax.block_until_ready(ResidualAdd(jax.nn.gelu)(x5))
    ref5 = jax.nn.gelu(x5) + x5
    assert out5.dtype == jnp.bfloat16
    assert jnp.allclose(out5.astype(jnp.float32), ref5.astype(jnp.float32),
                        atol=2e-2, rtol=2e-2)

    print("KERNEL_OK")
</pallas_src>

<mosaic_0001>
module attributes {stable_mosaic.version = 11 : i64} {
  func.func @_probe(%arg0: i32, %arg1: memref<8x128xf32, #tpu.memory_space<vmem>>, %arg2: memref<8x128xf32, #tpu.memory_space<vmem>>) attributes {dimension_semantics = [#tpu.dimension_semantics<core_parallel>], iteration_bounds = array<i64: 3>, scalar_prefetch = 0 : i64, scratch_operands = 0 : i64, tpu.core_type = #tpu.core_type<tc>, window_params = [{transform_indices = @transform_0, window_bounds = array<i64: 8, 128>}, {transform_indices = @transform_1, window_bounds = array<i64: 8, 128>}]} {
    %c0 = arith.constant 0 : index
    %c0_0 = arith.constant 0 : index
    %0 = vector.load %arg1[%c0, %c0_0] : memref<8x128xf32, #tpu.memory_space<vmem>>, vector<8x128xf32>
    %cst = arith.constant 1.000000e+00 : f32
    %1 = vector.broadcast %cst : f32 to vector<8x128xf32>
    %2 = arith.addf %0, %1 : vector<8x128xf32>
    %c0_1 = arith.constant 0 : index
    %c0_2 = arith.constant 0 : index
    %3 = vector.load %arg2[%c0_1, %c0_2] : memref<8x128xf32, #tpu.memory_space<vmem>>, vector<8x128xf32>
    tpu.vector_store %arg2[%c0_1, %c0_2], %2 {strides = array<i32>} : memref<8x128xf32, #tpu.memory_space<vmem>>, vector<8x128xf32>,
    return
  }
  func.func @transform_0(%arg0: i32) -> (i32, i32) {
    %c0_i32 = arith.constant 0 : i32
    %c0_i32_0 = arith.constant 0 : i32
    return %arg0, %c0_i32 : i32, i32
  }
  func.func @transform_1(%arg0: i32) -> (i32, i32) {
    %c0_i32 = arith.constant 0 : i32
    %c0_i32_0 = arith.constant 0 : i32
    return %arg0, %c0_i32 : i32, i32
  }
}

module attributes {stable_mosaic.version = 11 : i64} {
  func.func @kernel(%arg0: i32, %arg1: memref<8x128xf32, #tpu.memory_space<vmem>>, %arg2: memref<8x128xf32, #tpu.memory_space<vmem>>) attributes {dimension_semantics = [#tpu.dimension_semantics<parallel>], iteration_bounds = array<i64: 2>, scalar_prefetch = 0 : i64, scratch_operands = 0 : i64, tpu.core_type = #tpu.core_type<tc>, window_params = [{transform_indices = @transform_0, window_bounds = array<i64: 8, 128>}, {transform_indices = @transform_1, window_bounds = array<i64: 8, 128>}]} {
    %c0 = arith.constant 0 : index
    %c0_0 = arith.constant 0 : index
    %0 = vector.load %arg1[%c0, %c0_0] : memref<8x128xf32, #tpu.memory_space<vmem>>, vector<8x128xf32>
    %1 = arith.mulf %0, %0 : vector<8x128xf32>
    %2 = arith.mulf %0, %1 : vector<8x128xf32>
    %cst = arith.constant 4.471500e-02 : f32
    %3 = vector.broadcast %cst : f32 to vector<8x128xf32>
    %4 = arith.mulf %3, %2 : vector<8x128xf32>
    %5 = arith.addf %0, %4 : vector<8x128xf32>
    %cst_1 = arith.constant 0.797884583 : f32
    %6 = vector.broadcast %cst_1 : f32 to vector<8x128xf32>
    %7 = arith.mulf %6, %5 : vector<8x128xf32>
    %8 = math.tanh %7 : vector<8x128xf32>
    %cst_2 = arith.constant 1.000000e+00 : f32
    %9 = vector.broadcast %cst_2 : f32 to vector<8x128xf32>
    %10 = arith.addf %9, %8 : vector<8x128xf32>
    %cst_3 = arith.constant 5.000000e-01 : f32
    %11 = vector.broadcast %cst_3 : f32 to vector<8x128xf32>
    %12 = arith.mulf %11, %10 : vector<8x128xf32>
    %13 = arith.mulf %0, %12 : vector<8x128xf32>
    %14 = arith.addf %13, %0 : vector<8x128xf32>
    %c0_4 = arith.constant 0 : index
    %c0_5 = arith.constant 0 : index
    %15 = vector.load %arg2[%c0_4, %c0_5] : memref<8x128xf32, #tpu.memory_space<vmem>>, vector<8x128xf32>
    tpu.vector_store %arg2[%c0_4, %c0_5], %14 {strides = array<i32>} : memref<8x128xf32, #tpu.memory_space<vmem>>, vector<8x128xf32>,
    return
  }
  func.func @transform_0(%arg0: i32) -> (i32, i32) {
    %c0_i32 = arith.constant 0 : i32
    %c0_i32_0 = arith.constant 0 : i32
    return %arg0, %c0_i32 : i32, i32
  }
  func.func @transform_1(%arg0: i32) -> (i32, i32) {
    %c0_i32 = arith.constant 0 : i32
    %c0_i32_0 = arith.constant 0 : i32
    return %arg0, %c0_i32 : i32, i32
  }
}

</mosaic_0001>

<bundles_post_ra>
// kernel: tpu_custom_call.1
= control target key start
LH: loop header
LB: loop body
LE: loop exit
PB: predicated region body
PF: predicated region fallthrough
CT: control target
= control target key end

     0   :  { %6 = vsyncpa [#allocation3], 0  ;;  %s559_s0 = inlined_call_operand.hbm [shape: f32[16,128], index: 0, kind: input, shape index: {}]   ;;  %s560_s1 = inlined_call_operand.hbm [shape: f32[16,128], index: 1, kind: output, shape index: {}]  }
   0x1   :  { %8 = vsyncpa [#allocation3 + $0x1], 0 }
   0x2   :  { %9 = vsyncpa [#allocation4], 0 }
   0x3   :  { %11 = vsyncpa [#allocation4 + $0x1], 0  ;;  %s398_s6 = smov 0   ;;  %s400_s7 = smov 0  }
   0x4   :  { %s402_s8 = smov 0   ;;  %s404_s9 = smov 0  }
   0x5 LB: > { %s419_s10 = sadd.s32 4294967295, %s384_s9   ;;  %s228_s11 = sadd.s32 4294967294, %s384_s9   ;;  %s384_s9 = sphi %s404_s9, %s575_s9   ;;  %s380_s8 = sphi %s402_s8, %s574_s8   ;;  %s376_s7 = sphi %s400_s7, %s573_s7   ;;  %s372_s6 = sphi %s398_s6, %s572_s6  }
   0x6   : > { %s423_s12 = sadd.s32 1, %s384_s9   ;;  %s24_s13 = sadd.s32 1, %s380_s8 }
   0x7   : > { %s21_s14 = ssub.s32 %s384_s9, %s423_s12  ;;  %p31_p0 = scmp.ne.s32.totalorder %s380_s8, %s376_s7 }
   0x8   : > { %p22_p1 = scmp.eq.s32.totalorder %s21_s14, 0  ;;  %p32_p2 = scmp.eq.s32.totalorder %s384_s9, 0 }
   0x9   : > { %p37_p3 = scmp.ne.s32.totalorder %s376_s7, %s372_s6  ;;  %p38_p4 = scmp.eq.s32.totalorder %s419_s10, 0 }
   0xa   : > { %s435_s15 = scalar_select %p22_p1, %s380_s8, %s24_s13  }
   0xb   : > { %p437_p5 = por %p32_p2, %p31_p0  ;;  %p441_p6 = por %p38_p4, %p37_p3 }
   0xc   : > { %p61_p7 = scmp.eq.s32.totalorder %s419_s10, 1  ;;  %p67_p8 = scmp.eq.s32.totalorder %s228_s11, 1 }
   0xd   : > { %p252_p10 = scmp.lt.s32.totalorder %s384_s9, 2  ;;  %s87_s20 = sand.u32 1, %s380_s8  }
   0xe   : > { %p448_p11 = por %p61_p7, %p31_p0  ;;  %p452_p12 = por %p67_p8, %p37_p3 }
   0xf   : > { %s232_s21 = sshll.u32 %s384_s9, 7  ;;  %s231_s22 = sshll.u32 %s87_s20, 3 }
  0x10   : > { %s564_s18 = scalar_select %p448_p11, 1, 0 }
  0x11   : > { %s565_s19 = scalar_select %p452_p12, 1, 0 }
  0x12   : > { %s461_s25 = scalar_lea.hbm %s559_s0, %s232_s21  ;;  %s91_s26 = scalar_lea.vmem [#allocation2], %s231_s22 }
  0x13   : > { %s98_s27 = sshll.u32 %s91_s26, 4  ;;  %p465_p13 = pnand %p252_p10, %p437_p5  ;;  %s469_s27 = int_to_ptr.vmem [resolvable:$true] %s98_s27 }
  0x14   : > { %s88_s29 = scalar_lea.sflag [#allocation3], %s87_s20  ;;  %s288_s30 = scalar_lea.hbm %s461_s25, 128 }
  0x15   : > { %p289_p2 = scmp.ne.s32.totalorder %s461_s25, %s288_s30  ;;  %p290_p3 = pneg %p465_p13 }
  0x16   : > { %s293_s4 = scalar_lea.hbm %s559_s0, 256  ;;  %p294_p5 = scmp.lt.u32.totalorder %s461_s25, %s559_s0 }
  0x17   : > { %p291_p4 = pnand %p290_p3, %p289_p2  ;;  %p295_p8 = scmp.lt.u32.totalorder %s293_s4, %s288_s30 }
  0x18   : > { %p297_p9 = scmp.lt.u32.totalorder %s288_s30, %s461_s25 }
  0x19   : > { %p292_p7 = pneg %p291_p4  ;;  %p296_p10 = por %p295_p8, %p294_p5 }
  0x1b   : > { %p298_p0 = por %p297_p9, %p296_p10 }
  0x1d   : > { %p299_p1 = pnand %p298_p0, %p292_p7 }
  0x1f   : > { %302 = shalt.err (!%p299_p1)
}
  0x20   : > { %s303_s13 = scalar_lea.vmem %s469_s27, 128  ;;  %s386_s14 = smov [#allocation2]  }
  0x21   : > { %p304_p2 = scmp.ne.s32.totalorder %s469_s27, %s303_s13  ;;  %s308_s16 = sshll.u32 %s386_s14, 4  ;;  %s309_s16 = int_to_ptr.vmem [resolvable:$false] %s308_s16 }
  0x22   : > { %s310_s20 = scalar_lea.vmem %s309_s16, 256  ;;  %p311_p11 = scmp.lt.s32.totalorder %s469_s27, %s309_s16 }
  0x23   : > { %p306_p4 = pnand %p304_p2, %p290_p3  ;;  %p312_p5 = scmp.lt.s32.totalorder %s310_s20, %s303_s13 }
  0x25   : > { %p307_p12 = pneg %p306_p4  ;;  %p313_p8 = por %p312_p5, %p311_p11 }
  0x27   : > { %p314_p9 = pnand %p313_p8, %p307_p12 }
  0x29   : > { %317 = shalt.err (!%p314_p9)
}
  0x2a   : > { %247 = dma.hbm_to_vmem [thread:$0]  (!%p465_p13), %s461_s25, 128, %s469_s27, %s88_s29  }
  0x2b   : > { %p567_p0 = scmp.lt.s32.totalorder %s384_s9, 3  ;;  %p568_p1 = scmp.ge.s32.totalorder %s384_s9, 1 }
  0x2d   : > { %p104_p3 = pnand %p568_p1, %p567_p0 }
  0x2e   : > { %s503_s21 = sand.u32 (!%p104_p3), 1, %s376_s7  }
  0x2f   : > { %107 = sbr.rel (%p104_p3) target bundleno = 99 (0x63), region = 24  ;;  %s234_s22 = sshll.u32 (!%p104_p3), %s503_s21, 3 }
  0x30   : > { %s110_s23 = scalar_lea.sflag (!%p104_p3), [#allocation3], %s503_s21  ;;  %s113_s24 = scalar_lea.vmem (!%p104_p3), [#allocation2], %s234_s22 }
  0x36   : > { %363 = dma.done.wait (%p441_p6), %s110_s23, 128  }
  0x37   : > { %365 = vsyncadd (%p441_p6), %s110_s23, 4294967168  ;;  %v132_v0 = vld [vmem:[%s113_s24] sm:$0xff]  ;;  %s131_s25 = scalar_lea.vmem [#allocation5], %s234_s22  ;;  %s237_s27 = sshll.u32 %s419_s10, 7 }
  0x38   : > { %v133_v1 = vmul.f32 %v132_v0, %v132_v0  ;;  %s158_s26 = sshll.u32 %s131_s25, 4  ;;  %s517_s29 = scalar_lea.hbm %s560_s1, %s237_s27  ;;  %s512_s26 = int_to_ptr.vmem [resolvable:$true] %s158_s26 }
  0x39   : > { %s145_s30 = scalar_lea.sflag [#allocation4], %s503_s21  ;;  %s318_s2 = scalar_lea.vmem %s512_s26, 128 }
  0x3a   : > { %v134_v2 = vmul.f32 %v133_v1, %v132_v0  ;;  %p319_p6 = scmp.ne.s32.totalorder %s512_s26, %s318_s2  ;;  %p569_p11 = scmp.ne.s32.totalorder %s564_s18, 0 }
  0x3b   : > { %s387_s10 = smov [#allocation5]  }
  0x3c   : > { %v135_v3 = vmul.f32 0.044715, %v134_v2  ;;  %p320_p12 = pnand %p319_p6, %p569_p11  ;;  %s322_s3 = sshll.u32 %s387_s10, 4  ;;  %s323_s3 = int_to_ptr.vmem [resolvable:$false] %s322_s3 }
  0x3d   : > { %s324_s4 = scalar_lea.vmem %s323_s3, 256  ;;  %p325_p7 = scmp.lt.s32.totalorder %s512_s26, %s323_s3 }
  0x3e   : > { %v136_v4 = vadd.f32 %v135_v3, %v132_v0  ;;  %p321_p13 = pneg %p320_p12  ;;  %p326_p10 = scmp.lt.s32.totalorder %s324_s4, %s318_s2 }
  0x40   : > { %v137_v5 = vmul.f32 0.7978846, %v136_v4  ;;  %p327_p2 = por %p326_p10, %p325_p7 }
  0x42   : > { %286 = vtanh.f32 %v137_v5  ;;  %p328_p4 = pnand %p327_p2, %p321_p13 }
  0x4c   : > { %v287_v6 = vpop.eup %286 }
  0x4d   : > { %v139_v7 = vadd.f32 1.0, %v287_v6 }
  0x4f   : > { %v140_v8 = vmul.f32 0.5, %v139_v7 }
  0x51   : > { %v141_v9 = vmul.f32 %v140_v8, %v132_v0 }
  0x53   : > { %v142_v10 = vadd.f32 %v141_v9, %v132_v0 }
  0x55   : > { %143 = vst [vmem:[%s131_s25] sm:$0xff] %v142_v10 }
  0x56   : > { %331 = shalt.err (!%p328_p4)
}
  0x57   : > { %s332_s5 = scalar_lea.hbm %s517_s29, 128  ;;  %s336_s14 = scalar_lea.hbm %s560_s1, 256 }
  0x58   : > { %p333_p5 = scmp.ne.s32.totalorder %s517_s29, %s332_s5  ;;  %p337_p0 = scmp.lt.u32.totalorder %s517_s29, %s560_s1 }
  0x59   : > { %p338_p1 = scmp.lt.u32.totalorder %s336_s14, %s332_s5  ;;  %p340_p6 = scmp.lt.u32.totalorder %s332_s5, %s517_s29 }
  0x5a   : > { %p334_p8 = pnand %p333_p5, %p569_p11 }
  0x5b   : > { %p339_p3 = por %p338_p1, %p337_p0 }
  0x5c   : > { %p335_p9 = pneg %p334_p8 }
  0x5d   : > { %p341_p12 = por %p340_p6, %p339_p3 }
  0x5f   : > { %p342_p13 = pnand %p341_p12, %p335_p9 }
  0x61   : > { %345 = shalt.err (!%p342_p13)
}
  0x62   : > { %242 = dma.vmem_to_hbm [thread:$0]  (%p569_p11), %s512_s26, 128, %s517_s29, %s145_s30  }
  0x63 PF: > { %s170_s21 = sand.u32 1, %s372_s6   ;;  %p570_p7 = scmp.ne.s32.totalorder %s565_s19, 0 }
  0x64   : > { %p571_p10 = scmp.ge.s32.totalorder %s384_s9, 2  ;;  %s171_s22 = scalar_lea.sflag [#allocation4], %s170_s21 }
  0x66   : > { %p249_p2 = pnand %p571_p10, %p570_p7 }
  0x68   : > { %367 = dma.done.wait (!%p249_p2), %s171_s22, 128  }
  0x69   : > { %369 = vsyncadd (!%p249_p2), %s171_s22, 4294967168  ;;  %p14_p4 = scmp.ge.s32.totalorder %s423_s12, 4   ;;  %s572_s6 = smov %s376_s7 }
  0x6a   : > { %s573_s7 = smov %s380_s8  ;;  %s574_s8 = smov %s435_s15 }
  0x6b   : > { %s575_s9 = smov %s423_s12  ;;  %16 = sbr.rel (!%p14_p4) target bundleno = 5 (0x5), region = 69 }
  0x72   :  { %176 = vsyncpa [#allocation3], 1 }
  0x73   :  { %178 = vsyncpa [#allocation3 + $0x1], 1 }
  0x74   :  { %179 = vsyncpa [#allocation4], 1 }
  0x75   :  { %181 = vsyncpa [#allocation4 + $0x1], 1 }

</bundles_post_ra>
